<compile_context>
chip_gen: v7x
topology: tpu7x:2x2x1
jax: 0.10.0
libtpu: 0.0.40
codegen_flags: <defaults>
</compile_context>

<pallas_src>
import functools

import jax
import jax.numpy as jnp
from jax.experimental import pallas as pl
from jax.experimental.pallas import tpu as pltpu

MAX_LOGVAR = 2.0
MIN_LOGVAR = -1.0

_LANE = 128
_SUBLANE = 8


def _round_up(n, m):
    return ((n + m - 1) // m) * m


# --------------------------------------------------------------------------- #
# Kernel
# --------------------------------------------------------------------------- #
def _apply_nonlinearity(y, nonlinearity):
    if nonlinearity is None:
        return y
    if nonlinearity == 'hard':
        return jnp.minimum(jnp.maximum(y, MIN_LOGVAR), MAX_LOGVAR)   # VPU min/max
    if nonlinearity == 'softplus':
        # numerically stable softplus with plain exp/log (EUP slot)
        return jnp.maximum(y, 0.0) + jnp.log(1.0 + jnp.exp(-jnp.abs(y)))
    if nonlinearity == 'tanh':
        return jnp.tanh(y)                                           # EUP
    if nonlinearity == '2tanh':
        return 2.0 * jnp.tanh(y)
    raise ValueError(f"unknown nonlinearity: {nonlinearity}")


def _finalize(y, b_ref, out_refs, *, nonlinearity, d_out, separate_outputs):
    y = y + b_ref[...]                       # bias kept in f32
    if separate_outputs:
        # D_out % 128 == 0: lane-aligned static slices, no relayout, nl only on
        # the logvar half (halves EUP pushes vs. the full-slab masked path).
        mu_ref, lv_ref = out_refs
        mu_ref[...] = y[:, :d_out].astype(mu_ref.dtype)
        lv = _apply_nonlinearity(y[:, d_out:], nonlinearity)
        lv_ref[...] = lv.astype(lv_ref.dtype)
    else:
        (out_ref,) = out_refs
        if nonlinearity is not None:
            nl = _apply_nonlinearity(y, nonlinearity)
            # 1-row column mask, broadcast by jnp.where (cheap vs. full iota).
            cols = jax.lax.broadcasted_iota(jnp.int32, (1, y.shape[1]), 1)
            y = jnp.where(cols >= d_out, nl, y)   # mu lanes keep identity
        out_ref[...] = y.astype(out_ref.dtype)


def _normal_dist_kernel(x_ref, w_ref, b_ref, *rest, nonlinearity, d_out,
                        num_k, separate_outputs, cast_to):
    if num_k > 1:
        acc_ref = rest[-1]
        out_refs = rest[:-1]
    else:
        acc_ref = None
        out_refs = rest

    x = x_ref[...]
    w = w_ref[...]
    if cast_to is not None:
        # bf16 MXU path: cast after the DMA so x crosses HBM once in f32.
        x = x.astype(cast_to)
        w = w.astype(cast_to)
    part = jnp.dot(x, w, preferred_element_type=jnp.float32)

    if num_k == 1:
        _finalize(part, b_ref, out_refs, nonlinearity=nonlinearity,
                  d_out=d_out, separate_outputs=separate_outputs)
    else:
        k = pl.program_id(1)

        @pl.when(k == 0)
        def _():
            acc_ref[...] = jnp.zeros_like(acc_ref)

        acc_ref[...] += part

        @pl.when(k == num_k - 1)
        def _():
            _finalize(acc_ref[...], b_ref, out_refs, nonlinearity=nonlinearity,
                      d_out=d_out, separate_outputs=separate_outputs)


# --------------------------------------------------------------------------- #
# Generation-aware tiling / VMEM sizing helpers
# --------------------------------------------------------------------------- #
def _tpu_topology():
    """Returns (vmem_capacity_bytes, num_tensorcores) with safe fallbacks."""
    vmem_cap = 128 << 20
    num_tc = 1
    kind = ""
    try:
        kind = jax.devices()[0].device_kind.lower()
    except Exception:
        pass
    try:
        info = pltpu.get_tpu_info()
        vmem_cap = int(getattr(info, "vmem_capacity_bytes", vmem_cap))
        for attr in ("num_tensorcores", "tensorcores_per_chip", "num_cores"):
            v = getattr(info, attr, None)
            if isinstance(v, int) and v > 0:
                num_tc = v
                break
    except Exception:
        pass
    if "v7" in kind:
        num_tc = max(num_tc, 2)
        vmem_cap = min(vmem_cap, 64 << 20)
    return vmem_cap, max(1, min(num_tc, 4))


def _pick_tile_b(batch, row_align, per_row_stream, per_row_vmem, fixed_vmem,
                 budget, num_tc):
    b_al = _round_up(batch, row_align)
    t = b_al
    # Keep per-step streamed (x + output) bytes at a multi-MiB sweet spot so
    # the ~0.35 us per-grid-step overhead is amortized without monster DMAs.
    cap_rows = (16 << 20) // max(per_row_stream, 1)
    cap_rows = max(row_align, (cap_rows // row_align) * row_align)
    t = min(t, cap_rows)
    # Only split the batch when there are multiple TensorCores to feed (v7x);
    # on v5e/v6e the grid is a serial loop and extra steps are pure overhead.
    if num_tc > 1 and b_al > row_align:
        t = min(t, _round_up(pl.cdiv(b_al, num_tc), row_align))
    # Fit the generation-aware VMEM budget.
    while t > row_align and fixed_vmem + t * per_row_vmem > budget:
        t = _round_up(t // 2, row_align)
    return max(min(t, b_al), row_align)


# --------------------------------------------------------------------------- #
# Wrapper
# --------------------------------------------------------------------------- #
def normal_distribution_forward(x, w_mu, b_mu, w_lv, b_lv, nonlinearity=None,
                                tile_b=None, tile_k=None, use_bf16=False):
    """Returns (mu, logvar), matching NormalDistribution.forward with Linear heads.

    x      : [B, D_in]
    w_mu   : [D_in, D_out]   (transpose of PyTorch's nn.Linear weight layout)
    b_mu   : [D_out] or [1, D_out]
    w_lv   : [D_in, D_out]
    b_lv   : [D_out] or [1, D_out]
    """
    B, D_in = x.shape
    D_out = w_mu.shape[1]
    out_dtype = x.dtype

    # ---- Fuse the two Linear heads into one wide [D_in, 2*D_out] matmul.
    w = jnp.concatenate([w_mu, w_lv], axis=1)
    b = jnp.concatenate([b_mu.reshape(1, -1), b_lv.reshape(1, -1)],
                        axis=1).astype(jnp.float32)

    separate_outputs = (D_out % _LANE == 0)   # lane-aligned mu / logvar outputs
    n_fused = 2 * D_out
    n_pad = n_fused if separate_outputs else _round_up(n_fused, _LANE)
    if n_pad != n_fused:
        w = jnp.pad(w, ((0, 0), (0, n_pad - n_fused)))
        b = jnp.pad(b, ((0, 0), (0, n_pad - n_fused)))

    # Weights are rebuilt here anyway, so pre-casting them is free; x is cast
    # inside the kernel so it only crosses HBM once, in its source dtype.
    w_dtype = jnp.bfloat16 if use_bf16 else x.dtype
    w = w.astype(w_dtype)
    cast_to = jnp.bfloat16 if (use_bf16 and x.dtype != jnp.bfloat16) else None

    x_item = jnp.dtype(x.dtype).itemsize
    w_item = jnp.dtype(w_dtype).itemsize
    out_item = jnp.dtype(out_dtype).itemsize

    vmem_cap, num_tc = _tpu_topology()
    budget = min((vmem_cap * 3) // 4, vmem_cap - (16 << 20))   # 96 MiB / 48 MiB
    limit_cap = budget + (4 << 20)                             # 100 MiB / 52 MiB

    # ---- K (D_in) tiling: only when the fused weight would hog VMEM.
    if tile_k is None:
        if D_in * n_pad * w_item > (12 << 20):
            tile_k = max(_LANE, ((4 << 20) // (n_pad * w_item)) // _LANE * _LANE)
        else:
            tile_k = D_in
    if tile_k >= D_in:
        tile_k, num_k = D_in, 1
    else:
        tile_k = _round_up(tile_k, _LANE)
        num_k = pl.cdiv(D_in, tile_k)
        if num_k <= 1:
            tile_k, num_k = D_in, 1

    x_in = x
    if num_k > 1:
        k_pad = num_k * tile_k
        if k_pad != D_in:
            # Zero-pad BOTH operands along K so the ragged tail contributes 0.
            x_in = jnp.pad(x_in, ((0, 0), (0, k_pad - D_in)))
            w = jnp.pad(w, ((0, k_pad - D_in), (0, 0)))

    # ---- Batch tiling (ragged last block; no wrapper zero-pad of x).
    min_item = min(x_item, out_item)
    row_align = _SUBLANE * max(1, 4 // max(min_item, 1))   # 8 f32, 16 bf16
    w_block_bytes = tile_k * n_pad * w_item
    b_block_bytes = _SUBLANE * n_pad * 4
    w_bufs = 2 if num_k > 1 else 1           # resident weight -> Buffered(1)
    fixed_vmem = w_bufs * w_block_bytes + b_block_bytes
    per_row_vmem = (2 * tile_k * x_item + 2 * n_pad * out_item
                    + (n_pad * 4 if num_k > 1 else 0))
    per_row_stream = tile_k * x_item + n_pad * out_item

    if tile_b is None:
        tile_b = _pick_tile_b(B, row_align, per_row_stream, per_row_vmem,
                              fixed_vmem, budget, num_tc)
    tile_b = _round_up(tile_b, row_align)

    grid_b = pl.cdiv(B, tile_b)
    b_pad = grid_b * tile_b

    # ---- VMEM limit (conservative: covers the Buffered(1) fallback) & cost.
    need = (fixed_vmem + tile_b * per_row_vmem
            + w_block_bytes + b_block_bytes)
    vmem_limit = int(min(max(need + need // 2 + (2 << 20), 32 << 20), limit_cap))

    transcendental = nonlinearity in ('softplus', 'tanh', '2tanh')
    n_nl = D_out if separate_outputs else n_pad
    k_total = tile_k * num_k
    cost = pl.CostEstimate(
        flops=2 * b_pad * k_total * n_pad,
        transcendentals=(b_pad * n_nl if transcendental else 0),
        bytes_accessed=(B * D_in * x_item                              # x
                        + (grid_b if num_k > 1 else 1)
                        * k_total * n_pad * w_item                     # fused W
                        + n_pad * 4                                    # fused bias
                        + b_pad * n_pad * out_item),                   # outputs
    )

    kernel = functools.partial(
        _normal_dist_kernel, nonlinearity=nonlinearity, d_out=D_out,
        num_k=num_k, separate_outputs=separate_outputs, cast_to=cast_to)

    if num_k > 1:
        grid = (grid_b, num_k)
        x_index = lambda i, k: (i, k)
        w_index = lambda i, k: (k, 0)
        c_index = lambda i, k: (0, 0)
        o_index = lambda i, k: (i, 0)
        semantics = ("parallel", "arbitrary")
        scratch = [pltpu.VMEM((tile_b, n_pad), jnp.float32)]
        w_const = False
    else:
        grid = (grid_b,)
        x_index = lambda i: (i, 0)
        w_index = lambda i: (0, 0)
        c_index = lambda i: (0, 0)
        o_index = lambda i: (i, 0)
        semantics = ("parallel",)
        scratch = []
        w_const = True

    if separate_outputs:
        out_shape = (jax.ShapeDtypeStruct((b_pad, D_out), out_dtype),
                     jax.ShapeDtypeStruct((b_pad, D_out), out_dtype))
        out_specs = [pl.BlockSpec((tile_b, D_out), o_index),
                     pl.BlockSpec((tile_b, D_out), o_index)]
    else:
        out_shape = jax.ShapeDtypeStruct((b_pad, n_pad), out_dtype)
        out_specs = pl.BlockSpec((tile_b, n_pad), o_index)

    def build(single_buffer_consts):
        def const_spec(shape, index_map, constant):
            if constant and single_buffer_consts:
                # Constant block index -> no benefit from double buffering.
                return pl.BlockSpec(shape, index_map,
                                    pipeline_mode=pl.Buffered(1))
            return pl.BlockSpec(shape, index_map)

        return pl.pallas_call(
            kernel,
            out_shape=out_shape,
            grid_spec=pltpu.PrefetchScalarGridSpec(
                num_scalar_prefetch=0,
                grid=grid,
                in_specs=[
                    pl.BlockSpec((tile_b, tile_k), x_index),      # x tile
                    const_spec((tile_k, n_pad), w_index, w_const),  # fused W
                    const_spec((1, n_pad), c_index, True),          # fused bias
                ],
                out_specs=out_specs,
                scratch_shapes=scratch),
            compiler_params=pltpu.CompilerParams(
                dimension_semantics=semantics,
                vmem_limit_bytes=vmem_limit),
            cost_estimate=cost,
        )

    try:
        outs = build(True)(x_in, w, b)
    except Exception:
        # Fallback if this runtime rejects pipeline_mode=pl.Buffered(1).
        outs = build(False)(x_in, w, b)

    if separate_outputs:
        mu, logvar = outs
        return mu[:B], logvar[:B]
    fused = outs
    return fused[:B, :D_out], fused[:B, D_out:n_fused]


# --------------------------------------------------------------------------- #
# Reference / init / test
# --------------------------------------------------------------------------- #
def _init_linear_params(key, d_in, d_out, dtype=jnp.float32):
    # PyTorch nn.Linear default: U(-1/sqrt(fan_in), 1/sqrt(fan_in))
    kw, kb = jax.random.split(key)
    bound = 1.0 / jnp.sqrt(jnp.float32(d_in))
    w = jax.random.uniform(kw, (d_in, d_out), dtype, -bound, bound)
    b = jax.random.uniform(kb, (1, d_out), dtype, -bound, bound)
    return w, b


def _reference(x, w_mu, b_mu, w_lv, b_lv, nonlinearity):
    mu = x @ w_mu + b_mu
    lv = x @ w_lv + b_lv
    if nonlinearity == 'hard':
        lv = jnp.clip(lv, MIN_LOGVAR, MAX_LOGVAR)
    elif nonlinearity == 'softplus':
        lv = jax.nn.softplus(lv)
    elif nonlinearity == 'tanh':
        lv = jnp.tanh(lv)
    elif nonlinearity == '2tanh':
        lv = 2.0 * jnp.tanh(lv)
    return mu, lv


if __name__ == "__main__":
    key = jax.random.PRNGKey(0)
    (k_x, k_x2, k_mu, k_lv, k_mu2, k_lv2,
     k_x3, k_mu3, k_lv3) = jax.random.split(key, 9)

    # 1) Fused-output path (D_out not a multiple of 128), f32, 'hard' clip.
    B, D_in, D_out = 16, 32, 64
    x = jax.random.normal(k_x, (B, D_in), jnp.float32) * 2.0  # exercise clipping
    w_mu, b_mu = _init_linear_params(k_mu, D_in, D_out)
    w_lv, b_lv = _init_linear_params(k_lv, D_in, D_out)

    mu, lv = normal_distribution_forward(x, w_mu, b_mu, w_lv, b_lv,
                                         nonlinearity='hard')
    jax.block_until_ready((mu, lv))
    mu_r, lv_r = _reference(x, w_mu, b_mu, w_lv, b_lv, 'hard')
    assert mu.shape == (B, D_out) and lv.shape == (B, D_out)
    assert jnp.allclose(mu, mu_r, atol=1e-5, rtol=1e-5)
    assert jnp.allclose(lv, lv_r, atol=1e-5, rtol=1e-5)

    # 2) Ragged batch (B % tile_b != 0, no wrapper zero-pad of x), 'tanh'.
    B2 = 13
    x2 = jax.random.normal(k_x2, (B2, D_in), jnp.float32)
    mu2, lv2 = normal_distribution_forward(x2, w_mu, b_mu, w_lv, b_lv,
                                           nonlinearity='tanh')
    jax.block_until_ready((mu2, lv2))
    mu2_r, lv2_r = _reference(x2, w_mu, b_mu, w_lv, b_lv, 'tanh')
    assert mu2.shape == (B2, D_out) and lv2.shape == (B2, D_out)
    assert jnp.allclose(mu2, mu2_r, atol=1e-5, rtol=1e-5)
    assert jnp.allclose(lv2, lv2_r, atol=1e-5, rtol=1e-5)

    # 3) bf16 MXU path (x cast inside the kernel, f32 accumulation), loose tol.
    mu3, lv3 = normal_distribution_forward(x, w_mu, b_mu, w_lv, b_lv,
                                           nonlinearity='hard', use_bf16=True)
    jax.block_until_ready((mu3, lv3))
    assert jnp.allclose(mu3, mu_r, atol=1e-1, rtol=1e-1)
    assert jnp.allclose(lv3, lv_r, atol=1e-1, rtol=1e-1)

    # 4) Separate lane-aligned mu/logvar outputs (D_out % 128 == 0), 'softplus'.
    D_out4 = 128
    w_mu4, b_mu4 = _init_linear_params(k_mu2, D_in, D_out4)
    w_lv4, b_lv4 = _init_linear_params(k_lv2, D_in, D_out4)
    mu4, lv4 = normal_distribution_forward(x, w_mu4, b_mu4, w_lv4, b_lv4,
                                           nonlinearity='softplus')
    jax.block_until_ready((mu4, lv4))
    mu4_r, lv4_r = _reference(x, w_mu4, b_mu4, w_lv4, b_lv4, 'softplus')
    assert mu4.shape == (B, D_out4) and lv4.shape == (B, D_out4)
    assert jnp.allclose(mu4, mu4_r, atol=1e-5, rtol=1e-5)
    assert jnp.allclose(lv4, lv4_r, atol=1e-5, rtol=1e-5)

    # 5) Forced K-tiling with ragged D_in (accumulator + zero-padded K), '2tanh'.
    D_in5 = 160
    x5 = jax.random.normal(k_x3, (B, D_in5), jnp.float32)
    w_mu5, b_mu5 = _init_linear_params(k_mu3, D_in5, D_out)
    w_lv5, b_lv5 = _init_linear_params(k_lv3, D_in5, D_out)
    mu5, lv5 = normal_distribution_forward(x5, w_mu5, b_mu5, w_lv5, b_lv5,
                                           nonlinearity='2tanh', tile_k=128)
    jax.block_until_ready((mu5, lv5))
    mu5_r, lv5_r = _reference(x5, w_mu5, b_mu5, w_lv5, b_lv5, '2tanh')
    assert jnp.allclose(mu5, mu5_r, atol=1e-4, rtol=1e-4)
    assert jnp.allclose(lv5, lv5_r, atol=1e-4, rtol=1e-4)

    # TODO(synk): sample_gaussian (randn_like reparameterization) is not part of
    # forward(); it can be added with pltpu.prng_seed/prng_random_bits if needed.
    print("KERNEL_OK")
</pallas_src>

<mosaic_0001>
module attributes {stable_mosaic.version = 11 : i64} {
  func.func @_normal_dist_kernel(%arg0: i32, %arg1: memref<16x32xf32, #tpu.memory_space<vmem>>, %arg2: memref<32x128xf32, #tpu.memory_space<vmem>>, %arg3: memref<1x128xf32, #tpu.memory_space<vmem>>, %arg4: memref<16x128xf32, #tpu.memory_space<vmem>>) attributes {dimension_semantics = [#tpu.dimension_semantics<parallel>], iteration_bounds = array<i64: 1>, scalar_prefetch = 0 : i64, scratch_operands = 0 : i64, tpu.core_type = #tpu.core_type<tc>, window_params = [{transform_indices = @transform_0, window_bounds = array<i64: 16, 32>}, {pipeline_mode = #tpu.pipeline_mode<synchronous>, transform_indices = @transform_1, window_bounds = array<i64: 32, 128>}, {pipeline_mode = #tpu.pipeline_mode<synchronous>, transform_indices = @transform_2, window_bounds = array<i64: 1, 128>}, {transform_indices = @transform_3, window_bounds = array<i64: 16, 128>}]} {
    %c0 = arith.constant 0 : index
    %c0_0 = arith.constant 0 : index
    %0 = vector.load %arg1[%c0, %c0_0] : memref<16x32xf32, #tpu.memory_space<vmem>>, vector<16x32xf32>
    %c0_1 = arith.constant 0 : index
    %c0_2 = arith.constant 0 : index
    %1 = vector.load %arg2[%c0_1, %c0_2] : memref<32x128xf32, #tpu.memory_space<vmem>>, vector<32x128xf32>
    %cst = arith.constant dense<0.000000e+00> : vector<16x128xf32>
    %2 = tpu.matmul %0, %1, %cst {dimension_numbers = #tpu.dot_dimension_numbers<[1], [0], [0], [1], [0, 0, 1, 1], [], []>} : vector<16x32xf32>, vector<32x128xf32>, vector<16x128xf32> -> vector<16x128xf32>
    %c0_3 = arith.constant 0 : index
    %c0_4 = arith.constant 0 : index
    %3 = vector.load %arg3[%c0_3, %c0_4] : memref<1x128xf32, #tpu.memory_space<vmem>>, vector<1x128xf32>
    %4 = vector.broadcast %3 : vector<1x128xf32> to vector<16x128xf32>
    %5 = arith.addf %2, %4 : vector<16x128xf32>
    %cst_5 = arith.constant -1.000000e+00 : f32
    %6 = vector.broadcast %cst_5 : f32 to vector<16x128xf32>
    %7 = arith.maximumf %5, %6 : vector<16x128xf32>
    %cst_6 = arith.constant 2.000000e+00 : f32
    %8 = vector.broadcast %cst_6 : f32 to vector<16x128xf32>
    %9 = arith.minimumf %7, %8 : vector<16x128xf32>
    %10 = tpu.iota {dimensions = array<i32: 1>} : vector<1x128xi32>
    %c64_i32 = arith.constant 64 : i32
    %11 = vector.broadcast %c64_i32 : i32 to vector<1x128xi32>
    %12 = arith.cmpi sge, %10, %11 : vector<1x128xi32>
    %13 = vector.shape_cast %12 : vector<1x128xi1> to vector<1x128xi1>
    %14 = vector.broadcast %13 : vector<1x128xi1> to vector<16x128xi1>
    %15 = arith.select %14, %9, %5 : vector<16x128xi1>, vector<16x128xf32>
    %c0_7 = arith.constant 0 : index
    %c0_8 = arith.constant 0 : index
    %16 = vector.load %arg4[%c0_7, %c0_8] : memref<16x128xf32, #tpu.memory_space<vmem>>, vector<16x128xf32>
    tpu.vector_store %arg4[%c0_7, %c0_8], %15 {strides = array<i32>} : memref<16x128xf32, #tpu.memory_space<vmem>>, vector<16x128xf32>,
    return
  }
  func.func @transform_0(%arg0: i32) -> (i32, i32) {
    %c0_i32 = arith.constant 0 : i32
    %c0_i32_0 = arith.constant 0 : i32
    return %arg0, %c0_i32 : i32, i32
  }
  func.func @transform_1(%arg0: i32) -> (i32, i32) {
    %c0_i32 = arith.constant 0 : i32
    %c0_i32_0 = arith.constant 0 : i32
    %c0_i32_1 = arith.constant 0 : i32
    return %c0_i32, %c0_i32_0 : i32, i32
  }
  func.func @transform_2(%arg0: i32) -> (i32, i32) {
    %c0_i32 = arith.constant 0 : i32
    %c0_i32_0 = arith.constant 0 : i32
    %c0_i32_1 = arith.constant 0 : i32
    return %c0_i32, %c0_i32_0 : i32, i32
  }
  func.func @transform_3(%arg0: i32) -> (i32, i32) {
    %c0_i32 = arith.constant 0 : i32
    %c0_i32_0 = arith.constant 0 : i32
    return %arg0, %c0_i32 : i32, i32
  }
}

module attributes {stable_mosaic.version = 11 : i64} {
  func.func @_normal_dist_kernel(%arg0: i32, %arg1: memref<16x32xf32, #tpu.memory_space<vmem>>, %arg2: memref<32x128xf32, #tpu.memory_space<vmem>>, %arg3: memref<1x128xf32, #tpu.memory_space<vmem>>, %arg4: memref<16x128xf32, #tpu.memory_space<vmem>>) attributes {dimension_semantics = [#tpu.dimension_semantics<parallel>], iteration_bounds = array<i64: 1>, scalar_prefetch = 0 : i64, scratch_operands = 0 : i64, tpu.core_type = #tpu.core_type<tc>, window_params = [{transform_indices = @transform_0, window_bounds = array<i64: 16, 32>}, {pipeline_mode = #tpu.pipeline_mode<synchronous>, transform_indices = @transform_1, window_bounds = array<i64: 32, 128>}, {pipeline_mode = #tpu.pipeline_mode<synchronous>, transform_indices = @transform_2, window_bounds = array<i64: 1, 128>}, {transform_indices = @transform_3, window_bounds = array<i64: 16, 128>}]} {
    %c0 = arith.constant 0 : index
    %c0_0 = arith.constant 0 : index
    %0 = vector.load %arg1[%c0, %c0_0] : memref<16x32xf32, #tpu.memory_space<vmem>>, vector<16x32xf32>
    %c0_1 = arith.constant 0 : index
    %c0_2 = arith.constant 0 : index
    %1 = vector.load %arg2[%c0_1, %c0_2] : memref<32x128xf32, #tpu.memory_space<vmem>>, vector<32x128xf32>
    %cst = arith.constant dense<0.000000e+00> : vector<16x128xf32>
    %2 = tpu.matmul %0, %1, %cst {dimension_numbers = #tpu.dot_dimension_numbers<[1], [0], [0], [1], [0, 0, 1, 1], [], []>} : vector<16x32xf32>, vector<32x128xf32>, vector<16x128xf32> -> vector<16x128xf32>
    %c0_3 = arith.constant 0 : index
    %c0_4 = arith.constant 0 : index
    %3 = vector.load %arg3[%c0_3, %c0_4] : memref<1x128xf32, #tpu.memory_space<vmem>>, vector<1x128xf32>
    %4 = vector.broadcast %3 : vector<1x128xf32> to vector<16x128xf32>
    %5 = arith.addf %2, %4 : vector<16x128xf32>
    %cst_5 = arith.constant -1.000000e+00 : f32
    %6 = vector.broadcast %cst_5 : f32 to vector<16x128xf32>
    %7 = arith.maximumf %5, %6 : vector<16x128xf32>
    %cst_6 = arith.constant 2.000000e+00 : f32
    %8 = vector.broadcast %cst_6 : f32 to vector<16x128xf32>
    %9 = arith.minimumf %7, %8 : vector<16x128xf32>
    %10 = tpu.iota {dimensions = array<i32: 1>} : vector<1x128xi32>
    %c64_i32 = arith.constant 64 : i32
    %11 = vector.broadcast %c64_i32 : i32 to vector<1x128xi32>
    %12 = arith.cmpi sge, %10, %11 : vector<1x128xi32>
    %13 = vector.shape_cast %12 : vector<1x128xi1> to vector<1x128xi1>
    %14 = vector.broadcast %13 : vector<1x128xi1> to vector<16x128xi1>
    %15 = arith.select %14, %9, %5 : vector<16x128xi1>, vector<16x128xf32>
    %c0_7 = arith.constant 0 : index
    %c0_8 = arith.constant 0 : index
    %16 = vector.load %arg4[%c0_7, %c0_8] : memref<16x128xf32, #tpu.memory_space<vmem>>, vector<16x128xf32>
    tpu.vector_store %arg4[%c0_7, %c0_8], %15 {strides = array<i32>} : memref<16x128xf32, #tpu.memory_space<vmem>>, vector<16x128xf32>,
    return
  }
  func.func @transform_0(%arg0: i32) -> (i32, i32) {
    %c0_i32 = arith.constant 0 : i32
    %c0_i32_0 = arith.constant 0 : i32
    return %arg0, %c0_i32 : i32, i32
  }
  func.func @transform_1(%arg0: i32) -> (i32, i32) {
    %c0_i32 = arith.constant 0 : i32
    %c0_i32_0 = arith.constant 0 : i32
    %c0_i32_1 = arith.constant 0 : i32
    return %c0_i32, %c0_i32_0 : i32, i32
  }
  func.func @transform_2(%arg0: i32) -> (i32, i32) {
    %c0_i32 = arith.constant 0 : i32
    %c0_i32_0 = arith.constant 0 : i32
    %c0_i32_1 = arith.constant 0 : i32
    return %c0_i32, %c0_i32_0 : i32, i32
  }
  func.func @transform_3(%arg0: i32) -> (i32, i32) {
    %c0_i32 = arith.constant 0 : i32
    %c0_i32_0 = arith.constant 0 : i32
    return %arg0, %c0_i32 : i32, i32
  }
}

</mosaic_0001>

<bundles_post_ra>
// kernel: tpu_custom_call.1
= control target key start
LH: loop header
LB: loop body
LE: loop exit
PB: predicated region body
PF: predicated region fallthrough
CT: control target
= control target key end

     0   :  { %8 = vsyncpa [#allocation3], 0  ;;  %s347_s0 = inlined_call_operand.hbm [shape: f32[16,32], index: 0, kind: input, shape index: {}]   ;;  %s348_s1 = inlined_call_operand.hbm [shape: f32[32,128], index: 1, kind: input, shape index: {}]   ;;  %s349_s2 = inlined_call_operand.vmem [shape: f32[1,128], index: 2, kind: input, shape index: {}]   ;;  %s350_s3 = inlined_call_operand.hbm [shape: f32[16,128], index: 3, kind: output, shape index: {}]  }
   0x1   :  { %9 = vsyncpa [#allocation6], 0 }
   0x2   :  { %10 = vsyncpa [#allocation4], 0  ;;  %s274_s12 = smov [#allocation2]   ;;  %s202_s16 = scalar_lea.hbm %s347_s0, 256 }
   0x3   :  { %s16_s13 = sshll.u32 %s274_s12, 4  ;;  %p203_p0 = scmp.ne.s32.totalorder %s347_s0, %s202_s16  ;;  %s17_s13 = int_to_ptr.vmem [resolvable:$true] %s16_s13 }
   0x4   :  { %p206_p1 = scmp.lt.u32.totalorder %s202_s16, %s347_s0 }
   0x6   :  { %p208_p2 = pnand %p206_p1, %p203_p0 }
   0x8   :  { %211 = shalt.err (!%p208_p2)
}
   0x9   :  { %s212_s21 = scalar_lea.vmem %s17_s13, 256  ;;  %p217_p4 = scmp.lt.s32.totalorder %s17_s13, %s17_s13 }
   0xa   :  { %p213_p3 = scmp.ne.s32.totalorder %s17_s13, %s212_s21  ;;  %p218_p5 = scmp.lt.s32.totalorder %s212_s21, %s212_s21 }
   0xc   :  { %p219_p6 = por %p218_p5, %p217_p4 }
   0xe   :  { %p220_p7 = pnand %p219_p6, %p213_p3 }
  0x10   :  { %223 = shalt.err (!%p220_p7)
}
  0x11   :  { %s275_s22 = smov 128   ;;  %s276_s23 = smov 8  }
  0x12   :  { %22 = dma.hbm_to_vmem [thread:$0]  %s347_s0, 256, %s17_s13, [#allocation3], %s275_s22, %s275_s22, %s276_s23  }
  0x13   :  { %s277_s26 = smov [#allocation5]   ;;  %s224_s30 = scalar_lea.hbm %s348_s1, 512 }
  0x14   :  { %s28_s27 = sshll.u32 %s277_s26, 4  ;;  %p225_p8 = scmp.ne.s32.totalorder %s348_s1, %s224_s30  ;;  %s29_s27 = int_to_ptr.vmem [resolvable:$true] %s28_s27 }
  0x15   :  { %p228_p9 = scmp.lt.u32.totalorder %s224_s30, %s348_s1 }
  0x17   :  { %p230_p10 = pnand %p228_p9, %p225_p8 }
  0x19   :  { %233 = shalt.err (!%p230_p10)
}
  0x1a   :  { %s234_s8 = scalar_lea.vmem %s29_s27, 512  ;;  %p239_p12 = scmp.lt.s32.totalorder %s29_s27, %s29_s27 }
  0x1b   :  { %p235_p11 = scmp.ne.s32.totalorder %s29_s27, %s234_s8  ;;  %p240_p13 = scmp.lt.s32.totalorder %s234_s8, %s234_s8 }
  0x1d   :  { %p241_p0 = por %p240_p13, %p239_p12 }
  0x1f   :  { %p242_p1 = pnand %p241_p0, %p235_p11 }
  0x21   :  { %245 = shalt.err (!%p242_p1)
}
  0x22   :  { %34 = dma.hbm_to_vmem [thread:$0]  %s348_s1, 512, %s29_s27, [#allocation6], %s275_s22, %s275_s22, %s276_s23  }
  0x23   :  { %268 = dma.done.wait [#allocation3], 256  }
  0x24   :  { %269 = vsyncadd [#allocation3], 4294967040 }
  0x25   :  { %270 = dma.done.wait [#allocation6], 512  }
  0x26   :  { %271 = vsyncadd [#allocation6], 4294966784  ;;  %vm56_vm0 = vcmask 261120   ;;  %v45_v0 = vld [vmem:[#allocation5] sm:$0xff]  ;;  %v46_v1 = vld [vmem:[#allocation5 + $0x8] sm:$0xff]  ;;  %v142_v8 = vlaneseq  ;;  %s278_s11 = smov [#allocation7]  }
  0x27   :  { %v47_v2 = vld [vmem:[#allocation5 + $0x10] sm:$0xff]  ;;  %v189_v3 = vpack.c.bf16 %v46_v1, %v45_v0  ;;  %v48_v4 = vld [vmem:[#allocation5 + $0x18] sm:$0xff]  ;;  %s156_s12 = sshll.u32 %s278_s11, 4  ;;  %s157_s12 = int_to_ptr.vmem [resolvable:$true] %s156_s12 }
  0x28   :  { %v43_v5 = vld [vmem:[#allocation2] sm:$0xff]  ;;  %v193_v6 = vpack.c.bf16 %v48_v4, %v47_v2  ;;  %v44_v7 = vld [vmem:[#allocation2 + $0x8] sm:$0xff]  ;;  %v143_v11 = vand.u32 127, %v142_v8  ;;  %s246_s13 = scalar_lea.vmem %s157_s12, 256  ;;  %p251_p3 = scmp.lt.s32.totalorder %s157_s12, %s157_s12 }
  0x29   :  { %186 = vmatprep.mubr.msk.f32.mxu0 %vm56_vm0, %v43_v5  ;;  %190 = vmatprep.subr.bf16.mxu0 %v189_v3  ;;  %v169_v9 = vld [vmem:[%s349_s2] ss:$0 sm:$0xff]  ;;  %p247_p2 = scmp.ne.s32.totalorder %s157_s12, %s246_s13  ;;  %p252_p4 = scmp.lt.s32.totalorder %s246_s13, %s246_s13 }
  0x2a   :  { %192 = vmatpush3.bf16.msra.mxu0 %v189_v3  ;;  %vm144_vm1 = vcmp.ge.s32.totalorder %v143_v11, 64 }
  0x2b   :  { %194 = vmatprep.subr.bf16.mxu0 %v193_v6  ;;  %p253_p5 = por %p252_p4, %p251_p3 }
  0x2d   :  { %p254_p6 = pnand %p253_p5, %p247_p2 }
  0x2e   :  { %196 = vmatpush3.bf16.msra.mxu0 %v193_v6 }
  0x31   :  { %187 = vmatmul.mubr.msk.f32.vlgmr.msra.gmra.mrb[0].mxu0 %vm56_vm0, %v44_v7 }
 0x104   :  { %v188_v10 = vpop.f32.mrb[0].mxu0 }
 0x105   :  { %v135_v12 = vadd.f32 %v188_v10, %v169_v9  ;;  %v129_v13 = vpop.f32.mrb[1].mxu0 }
 0x106   :  { %v130_v14 = vadd.f32 %v169_v9, %v129_v13 }
 0x107   :  { %v139_v15 = vmax.f32 %v135_v12, -1.0 }
 0x108   :  { %v138_v16 = vmax.f32 %v130_v14, -1.0 }
 0x109   :  { %v141_v17 = vmin.f32 %v139_v15, 2.0 }
 0x10a   :  { %v140_v18 = vmin.f32 %v138_v16, 2.0 }
 0x10b   :  { %v148_v19 = vsel %vm144_vm1, %v141_v17, %v135_v12 }
 0x10c   :  { %v147_v20 = vsel %vm144_vm1, %v140_v18, %v130_v14  ;;  %150 = vst [vmem:[#allocation7 + $0x8] sm:$0xff] %v148_v19 }
 0x10d   :  { %149 = vst [vmem:[#allocation7] sm:$0xff] %v147_v20 }
 0x10e   :  { %257 = shalt.err (!%p254_p6)
}
 0x10f   :  { %s258_s15 = scalar_lea.hbm %s350_s3, 256 }
 0x110   :  { %p259_p7 = scmp.ne.s32.totalorder %s350_s3, %s258_s15  ;;  %p262_p8 = scmp.lt.u32.totalorder %s258_s15, %s350_s3 }
 0x112   :  { %p264_p9 = pnand %p262_p8, %p259_p7 }
 0x114   :  { %267 = shalt.err (!%p264_p9)
}
 0x115   :  { %162 = dma.vmem_to_hbm [thread:$0]  %s157_s12, 256, %s350_s3, [#allocation4], %s275_s22, %s275_s22, %s276_s23  }
 0x116   :  { %272 = dma.done.wait [#allocation4], 256  }
 0x117   :  { %273 = vsyncadd [#allocation4], 4294967040 }
 0x118   :  { %166 = vsyncpa [#allocation3], 1 }
 0x119   :  { %167 = vsyncpa [#allocation6], 1 }
 0x11a   :  { %168 = vsyncpa [#allocation4], 1 }

// kernel: tpu_custom_call.1
= control target key start
LH: loop header
LB: loop body
LE: loop exit
PB: predicated region body
PF: predicated region fallthrough
CT: control target
= control target key end

     0   :  { %8 = vsyncpa [#allocation3], 0  ;;  %s347_s0 = inlined_call_operand.hbm [shape: f32[16,32], index: 0, kind: input, shape index: {}]   ;;  %s348_s1 = inlined_call_operand.hbm [shape: f32[32,128], index: 1, kind: input, shape index: {}]   ;;  %s349_s2 = inlined_call_operand.vmem [shape: f32[1,128], index: 2, kind: input, shape index: {}]   ;;  %s350_s3 = inlined_call_operand.hbm [shape: f32[16,128], index: 3, kind: output, shape index: {}]  }
   0x1   :  { %9 = vsyncpa [#allocation6], 0 }
   0x2   :  { %10 = vsyncpa [#allocation4], 0  ;;  %s274_s12 = smov [#allocation2]   ;;  %s202_s16 = scalar_lea.hbm %s347_s0, 256 }
   0x3   :  { %s16_s13 = sshll.u32 %s274_s12, 4  ;;  %p203_p0 = scmp.ne.s32.totalorder %s347_s0, %s202_s16  ;;  %s17_s13 = int_to_ptr.vmem [resolvable:$true] %s16_s13 }
   0x4   :  { %p206_p1 = scmp.lt.u32.totalorder %s202_s16, %s347_s0 }
   0x6   :  { %p208_p2 = pnand %p206_p1, %p203_p0 }
   0x8   :  { %211 = shalt.err (!%p208_p2)
}
   0x9   :  { %s212_s21 = scalar_lea.vmem %s17_s13, 256  ;;  %p217_p4 = scmp.lt.s32.totalorder %s17_s13, %s17_s13 }
   0xa   :  { %p213_p3 = scmp.ne.s32.totalorder %s17_s13, %s212_s21  ;;  %p218_p5 = scmp.lt.s32.totalorder %s212_s21, %s212_s21 }
   0xc   :  { %p219_p6 = por %p218_p5, %p217_p4 }
   0xe   :  { %p220_p7 = pnand %p219_p6, %p213_p3 }
  0x10   :  { %223 = shalt.err (!%p220_p7)
}
  0x11   :  { %s275_s22 = smov 128   ;;  %s276_s23 = smov 8  }
  0x12   :  { %22 = dma.hbm_to_vmem [thread:$0]  %s347_s0, 256, %s17_s13, [#allocation3], %s275_s22, %s275_s22, %s276_s23  }
  0x13   :  { %s277_s26 = smov [#allocation5]   ;;  %s224_s30 = scalar_lea.hbm %s348_s1, 512 }
  0x14   :  { %s28_s27 = sshll.u32 %s277_s26, 4  ;;  %p225_p8 = scmp.ne.s32.totalorder %s348_s1, %s224_s30  ;;  %s29_s27 = int_to_ptr.vmem [resolvable:$true] %s28_s27 }
  0x15   :  { %p228_p9 = scmp.lt.u32.totalorder %s224_s30, %s348_s1 }
  0x17   :  { %p230_p10 = pnand %p228_p9, %p225_p8 }
  0x19   :  { %233 = shalt.err (!%p230_p10)
}
  0x1a   :  { %s234_s8 = scalar_lea.vmem %s29_s27, 512  ;;  %p239_p12 = scmp.lt.s32.totalorder %s29_s27, %s29_s27 }
  0x1b   :  { %p235_p11 = scmp.ne.s32.totalorder %s29_s27, %s234_s8  ;;  %p240_p13 = scmp.lt.s32.totalorder %s234_s8, %s234_s8 }
  0x1d   :  { %p241_p0 = por %p240_p13, %p239_p12 }
  0x1f   :  { %p242_p1 = pnand %p241_p0, %p235_p11 }
  0x21   :  { %245 = shalt.err (!%p242_p1)
}
  0x22   :  { %34 = dma.hbm_to_vmem [thread:$0]  %s348_s1, 512, %s29_s27, [#allocation6], %s275_s22, %s275_s22, %s276_s23  }
  0x23   :  { %268 = dma.done.wait [#allocation3], 256  }
  0x24   :  { %269 = vsyncadd [#allocation3], 4294967040 }
  0x25   :  { %270 = dma.done.wait [#allocation6], 512  }
  0x26   :  { %271 = vsyncadd [#allocation6], 4294966784  ;;  %vm56_vm0 = vcmask 261120   ;;  %v45_v0 = vld [vmem:[#allocation5] sm:$0xff]  ;;  %v46_v1 = vld [vmem:[#allocation5 + $0x8] sm:$0xff]  ;;  %v142_v8 = vlaneseq  ;;  %s278_s11 = smov [#allocation7]  }
  0x27   :  { %v47_v2 = vld [vmem:[#allocation5 + $0x10] sm:$0xff]  ;;  %v189_v3 = vpack.c.bf16 %v46_v1, %v45_v0  ;;  %v48_v4 = vld [vmem:[#allocation5 + $0x18] sm:$0xff]  ;;  %s156_s12 = sshll.u32 %s278_s11, 4  ;;  %s157_s12 = int_to_ptr.vmem [resolvable:$true] %s156_s12 }
  0x28   :  { %v43_v5 = vld [vmem:[#allocation2] sm:$0xff]  ;;  %v193_v6 = vpack.c.bf16 %v48_v4, %v47_v2  ;;  %v44_v7 = vld [vmem:[#allocation2 + $0x8] sm:$0xff]  ;;  %v143_v11 = vand.u32 127, %v142_v8  ;;  %s246_s13 = scalar_lea.vmem %s157_s12, 256  ;;  %p251_p3 = scmp.lt.s32.totalorder %s157_s12, %s157_s12 }
  0x29   :  { %186 = vmatprep.mubr.msk.f32.mxu0 %vm56_vm0, %v43_v5  ;;  %190 = vmatprep.subr.bf16.mxu0 %v189_v3  ;;  %v169_v9 = vld [vmem:[%s349_s2] ss:$0 sm:$0xff]  ;;  %p247_p2 = scmp.ne.s32.totalorder %s157_s12, %s246_s13  ;;  %p252_p4 = scmp.lt.s32.totalorder %s246_s13, %s246_s13 }
  0x2a   :  { %192 = vmatpush3.bf16.msra.mxu0 %v189_v3  ;;  %vm144_vm1 = vcmp.ge.s32.totalorder %v143_v11, 64 }
  0x2b   :  { %194 = vmatprep.subr.bf16.mxu0 %v193_v6  ;;  %p253_p5 = por %p252_p4, %p251_p3 }
  0x2d   :  { %p254_p6 = pnand %p253_p5, %p247_p2 }
  0x2e   :  { %196 = vmatpush3.bf16.msra.mxu0 %v193_v6 }
  0x31   :  { %187 = vmatmul.mubr.msk.f32.vlgmr.msra.gmra.mrb[0].mxu0 %vm56_vm0, %v44_v7 }
 0x104   :  { %v188_v10 = vpop.f32.mrb[0].mxu0 }
 0x105   :  { %v135_v12 = vadd.f32 %v188_v10, %v169_v9  ;;  %v129_v13 = vpop.f32.mrb[1].mxu0 }
 0x106   :  { %v130_v14 = vadd.f32 %v169_v9, %v129_v13 }
 0x107   :  { %v139_v15 = vmax.f32 %v135_v12, -1.0 }
 0x108   :  { %v138_v16 = vmax.f32 %v130_v14, -1.0 }
 0x109   :  { %v141_v17 = vmin.f32 %v139_v15, 2.0 }
 0x10a   :  { %v140_v18 = vmin.f32 %v138_v16, 2.0 }
 0x10b   :  { %v148_v19 = vsel %vm144_vm1, %v141_v17, %v135_v12 }
 0x10c   :  { %v147_v20 = vsel %vm144_vm1, %v140_v18, %v130_v14  ;;  %150 = vst [vmem:[#allocation7 + $0x8] sm:$0xff] %v148_v19 }
 0x10d   :  { %149 = vst [vmem:[#allocation7] sm:$0xff] %v147_v20 }
 0x10e   :  { %257 = shalt.err (!%p254_p6)
}
 0x10f   :  { %s258_s15 = scalar_lea.hbm %s350_s3, 256 }
 0x110   :  { %p259_p7 = scmp.ne.s32.totalorder %s350_s3, %s258_s15  ;;  %p262_p8 = scmp.lt.u32.totalorder %s258_s15, %s350_s3 }
 0x112   :  { %p264_p9 = pnand %p262_p8, %p259_p7 }
 0x114   :  { %267 = shalt.err (!%p264_p9)
}
 0x115   :  { %162 = dma.vmem_to_hbm [thread:$0]  %s157_s12, 256, %s350_s3, [#allocation4], %s275_s22, %s275_s22, %s276_s23  }
 0x116   :  { %272 = dma.done.wait [#allocation4], 256  }
 0x117   :  { %273 = vsyncadd [#allocation4], 4294967040 }
 0x118   :  { %166 = vsyncpa [#allocation3], 1 }
 0x119   :  { %167 = vsyncpa [#allocation6], 1 }
 0x11a   :  { %168 = vsyncpa [#allocation4], 1 }

</bundles_post_ra>
